<compile_context>
chip_gen: v7x
topology: tpu7x:2x2x1
jax: 0.10.0
libtpu: 0.0.40
codegen_flags: <defaults>
</compile_context>

<pallas_src>
import jax
import jax.numpy as jnp
from jax.experimental import pallas as pl
from jax.experimental.pallas import tpu as pltpu

OUT_COLS = 8        # packed output width: col 0 = disc_real, col 1 = disc_fake
DEFAULT_TM = 2048   # max batch tile (mem-bound kernel; amortize grid overhead)
WCOLS = 128         # lane width of the packed bf16 weight slab


def _round_up(n, m):
    return (n + m - 1) // m * m


def _cdiv(a, b):
    return (a + b - 1) // b


def _layer_dims(input_dim, latent_dim):
    gen = [(latent_dim, 8), (8, 16), (16, 32), (32, input_dim)]
    enc = [(input_dim, 32), (32, 16), (16, 8), (8, latent_dim)]
    return gen, enc


def bigan_forward(x, z, params, *, tm_max=DEFAULT_TM):
    """x: (B, input_dim) f32, z: (B, latent_dim) f32.
    params: (gen_layers, enc_layers, disc_layers), each a list of (W, b) with
    W shaped (in_features, out_features) and b shaped (1, out_features).
    Returns (disc_real, disc_fake), each (B, 1) f32."""
    gen_p, enc_p, disc_p = params
    B, input_dim = x.shape
    latent_dim = z.shape[1]
    gen_dims, enc_dims = _layer_dims(input_dim, latent_dim)

    # ---- pack parameters into a few slabs (fewer, larger resident DMAs) ----
    (wd1, bd1), (wd2, bd2), (wd3, bd3), (wd4, bd4) = disc_p
    wd1a, wd1b = wd1[:input_dim], wd1[input_dim:]     # row-split of the cat-Linear

    bf16_weights = ([w for (w, _) in gen_p] + [w for (w, _) in enc_p]
                    + [wd1a, wd1b, wd2, wd3])          # 12 matrices, indices 0..11
    biases = ([b for (_, b) in gen_p] + [b for (_, b) in enc_p]
              + [bd1, bd2, bd3])                       # 11 biases, indices 0..10

    max_rows = _round_up(max(w.shape[0] for w in bf16_weights), 16)
    n_w = len(bf16_weights)
    w_slab = jnp.zeros((n_w, max_rows, WCOLS), jnp.bfloat16)
    for i, w in enumerate(bf16_weights):
        r, c = w.shape
        w_slab = w_slab.at[i, :r, :c].set(w.astype(jnp.bfloat16))

    n_b = len(biases) + 1                              # +1 for the packed final bias
    b_slab = jnp.zeros((n_b, WCOLS), jnp.float32)
    for i, b in enumerate(biases):
        b_slab = b_slab.at[i, :b.shape[-1]].set(b.reshape(-1))
    bd4_val = bd4.reshape(-1)[0]
    b_slab = b_slab.at[n_b - 1, 0].set(bd4_val)        # real-logit bias (col 0)
    b_slab = b_slab.at[n_b - 1, 1].set(bd4_val)        # fake-logit bias (col 1)

    # Final disc layer kept in f32: wd4_slab[0] maps h_real -> col 0,
    # wd4_slab[1] maps h_fake -> col 1 of the packed (TM, 8) logits.
    wd4_slab = jnp.zeros((2, 8, OUT_COLS), jnp.float32)
    wd4_slab = wd4_slab.at[0, :, 0].set(wd4[:, 0])
    wd4_slab = wd4_slab.at[1, :, 1].set(wd4[:, 0])

    # ---- batch tiling: >=2 tiles for v7x megacore, minimal row padding ----
    n_tiles = max(2, _cdiv(B, tm_max))
    tm = _round_up(_cdiv(B, n_tiles), 8)
    bp = _round_up(B, tm)
    if bp != B:
        x = jnp.pad(x, ((0, bp - B), (0, 0)))
        z = jnp.pad(z, ((0, bp - B), (0, 0)))
    grid = (bp // tm,)

    def kernel(x_ref, z_ref, w_ref, wd4_ref, b_ref, out_ref):
        # f32 tiles DMA'd straight from HBM; cast to bf16 on the VPU here.
        x_bf = x_ref[...].astype(jnp.bfloat16)          # (TM, input_dim)
        z_bf = z_ref[...].astype(jnp.bfloat16)          # (TM, latent_dim)

        def linear(h, wi, bi, din, dout):
            w = w_ref[wi, :din, :dout]                  # bf16 (din, dout)
            b = b_ref[bi:bi + 1, :dout]                 # f32  (1, dout)
            return jnp.dot(h, w, preferred_element_type=jnp.float32) + b

        def mlp4(h, w0, b0, dims):
            for li, (din, dout) in enumerate(dims):
                h = linear(h, w0 + li, b0 + li, din, dout)
                if li < len(dims) - 1:
                    h = jnp.maximum(h, 0.0)
                h = h.astype(jnp.bfloat16)
            return h

        gen = mlp4(z_bf, 0, 0, gen_dims)                # (TM, input_dim)  bf16
        enc = mlp4(x_bf, 4, 4, enc_dims)                # (TM, latent_dim) bf16

        def disc_hidden(h_a, h_b):
            # concat([a, b], -1) @ Wd1 == a @ Wd1a + b @ Wd1b  (no lane concat)
            h = jnp.dot(h_a, w_ref[8, :input_dim, :32],
                        preferred_element_type=jnp.float32)
            h = h + jnp.dot(h_b, w_ref[9, :latent_dim, :32],
                            preferred_element_type=jnp.float32)
            h = jnp.maximum(h + b_ref[8:9, :32], 0.0).astype(jnp.bfloat16)
            h = jnp.maximum(linear(h, 10, 9, 32, 16), 0.0).astype(jnp.bfloat16)
            h = jnp.maximum(linear(h, 11, 10, 16, 8), 0.0)
            return h                                     # (TM, 8) f32 (kept f32)

        h_real = disc_hidden(x_bf, enc)
        h_fake = disc_hidden(gen, z_bf)

        # Packed final layer: col 0 = real logit, col 1 = fake logit (f32, tiny).
        logits = (jnp.dot(h_real, wd4_ref[0], preferred_element_type=jnp.float32)
                  + jnp.dot(h_fake, wd4_ref[1], preferred_element_type=jnp.float32)
                  + b_ref[n_b - 1:n_b, :OUT_COLS])
        # sigmoid = 1 / (1 + exp(-x)); exp + reciprocal both go to the EUP.
        probs = pl.reciprocal(1.0 + jnp.exp(-logits), approx=True)
        out_ref[...] = probs.astype(out_ref.dtype)

    def batch_spec(cols):
        return pl.BlockSpec((tm, cols), lambda i: (i, 0))

    def resident_spec(arr):
        # Full-array block, constant index map: DMA'd once, stays VMEM-resident.
        return pl.BlockSpec(arr.shape, lambda i, nd=arr.ndim: (0,) * nd)

    out = pl.pallas_call(
        kernel,
        grid=grid,
        in_specs=[batch_spec(input_dim), batch_spec(latent_dim),
                  resident_spec(w_slab), resident_spec(wd4_slab),
                  resident_spec(b_slab)],
        out_specs=batch_spec(OUT_COLS),
        out_shape=jax.ShapeDtypeStruct((bp, OUT_COLS), jnp.float32),
        compiler_params=pltpu.CompilerParams(
            dimension_semantics=("parallel",),
            vmem_limit_bytes=64 * 1024 * 1024),
    )(x, z, w_slab, wd4_slab, b_slab)

    return out[:B, 0:1], out[:B, 1:2]


def _init_linear(key, fan_in, fan_out):
    """PyTorch nn.Linear default init (uniform +-1/sqrt(fan_in))."""
    kw, kb = jax.random.split(key)
    bound = float(fan_in) ** -0.5
    w = jax.random.uniform(kw, (fan_in, fan_out), jnp.float32, -bound, bound)
    b = jax.random.uniform(kb, (1, fan_out), jnp.float32, -bound, bound)
    return w, b


def init_params(key, input_dim, latent_dim):
    gen_dims = [(latent_dim, 8), (8, 16), (16, 32), (32, input_dim)]
    enc_dims = [(input_dim, 32), (32, 16), (16, 8), (8, latent_dim)]
    disc_dims = [(input_dim + latent_dim, 32), (32, 16), (16, 8), (8, 1)]
    params = []
    for dims in (gen_dims, enc_dims, disc_dims):
        layers = []
        for (fi, fo) in dims:
            key, sub = jax.random.split(key)
            layers.append(_init_linear(sub, fi, fo))
        params.append(layers)
    return tuple(params)


def bigan_reference(x, z, params):
    """Plain-JAX f32 reference of the same forward pass."""
    gen_p, enc_p, disc_p = params

    def mlp(h, layers):
        for i, (w, b) in enumerate(layers):
            h = h @ w + b
            if i < len(layers) - 1:
                h = jnp.maximum(h, 0.0)
        return h

    sigmoid = lambda v: 1.0 / (1.0 + jnp.exp(-v))
    gen = mlp(z, gen_p)
    enc = mlp(x, enc_p)
    real = sigmoid(mlp(jnp.concatenate([x, enc], axis=1), disc_p))
    fake = sigmoid(mlp(jnp.concatenate([gen, z], axis=1), disc_p))
    return real, fake


if __name__ == "__main__":
    input_dim = 32
    latent_dim = 32   # BiGAN_Ton2 default
    batch = 8

    key = jax.random.PRNGKey(0)
    key, kx, kz = jax.random.split(key, 3)
    x = jax.random.normal(kx, (batch, input_dim), dtype=jnp.float32)
    z = jax.random.normal(kz, (batch, latent_dim), dtype=jnp.float32)
    params = init_params(key, input_dim, latent_dim)

    disc_real, disc_fake = bigan_forward(x, z, params)
    disc_real, disc_fake = jax.block_until_ready((disc_real, disc_fake))

    ref_real, ref_fake = bigan_reference(x, z, params)
    assert disc_real.shape == (batch, 1) and disc_fake.shape == (batch, 1)
    # bf16 MXU inputs (f32 accumulation, f32 final layer) vs f32 reference
    assert jnp.allclose(disc_real, ref_real, atol=2e-2), "disc_real mismatch"
    assert jnp.allclose(disc_fake, ref_fake, atol=2e-2), "disc_fake mismatch"

    print("KERNEL_OK")
</pallas_src>

<mosaic_0001>
module attributes {stable_mosaic.version = 11 : i64} {
  func.func @kernel(%arg0: i32, %arg1: memref<8x32xf32, #tpu.memory_space<vmem>>, %arg2: memref<8x32xf32, #tpu.memory_space<vmem>>, %arg3: memref<12x32x128xbf16, #tpu.memory_space<vmem>>, %arg4: memref<2x8x8xf32, #tpu.memory_space<vmem>>, %arg5: memref<12x128xf32, #tpu.memory_space<vmem>>, %arg6: memref<8x8xf32, #tpu.memory_space<vmem>>) attributes {dimension_semantics = [#tpu.dimension_semantics<parallel>], iteration_bounds = array<i64: 1>, scalar_prefetch = 0 : i64, scratch_operands = 0 : i64, tpu.core_type = #tpu.core_type<tc>, window_params = [{transform_indices = @transform_0, window_bounds = array<i64: 8, 32>}, {transform_indices = @transform_1, window_bounds = array<i64: 8, 32>}, {pipeline_mode = #tpu.pipeline_mode<synchronous>, transform_indices = @transform_2, window_bounds = array<i64: 12, 32, 128>}, {pipeline_mode = #tpu.pipeline_mode<synchronous>, transform_indices = @transform_3, window_bounds = array<i64: 2, 8, 8>}, {pipeline_mode = #tpu.pipeline_mode<synchronous>, transform_indices = @transform_4, window_bounds = array<i64: 12, 128>}, {transform_indices = @transform_5, window_bounds = array<i64: 8, 8>}]} {
    %c0 = arith.constant 0 : index
    %c0_0 = arith.constant 0 : index
    %0 = vector.load %arg1[%c0, %c0_0] : memref<8x32xf32, #tpu.memory_space<vmem>>, vector<8x32xf32>
    %1 = arith.truncf %0 : vector<8x32xf32> to vector<8x32xbf16>
    %c0_1 = arith.constant 0 : index
    %c0_2 = arith.constant 0 : index
    %2 = vector.load %arg2[%c0_1, %c0_2] : memref<8x32xf32, #tpu.memory_space<vmem>>, vector<8x32xf32>
    %3 = arith.truncf %2 : vector<8x32xf32> to vector<8x32xbf16>
    %c0_3 = arith.constant 0 : index
    %c0_4 = arith.constant 0 : index
    %c0_5 = arith.constant 0 : index
    %4 = vector.load %arg3[%c0_3, %c0_4, %c0_5] : memref<12x32x128xbf16, #tpu.memory_space<vmem>>, vector<1x32x8xbf16>
    %5 = vector.shape_cast %4 : vector<1x32x8xbf16> to vector<32x8xbf16>
    %c0_6 = arith.constant 0 : index
    %c0_7 = arith.constant 0 : index
    %6 = vector.load %arg5[%c0_6, %c0_7] : memref<12x128xf32, #tpu.memory_space<vmem>>, vector<1x8xf32>
    %cst = arith.constant dense<0.000000e+00> : vector<8x8xf32>
    %7 = tpu.matmul %3, %5, %cst {dimension_numbers = #tpu.dot_dimension_numbers<[1], [0], [0], [1], [0, 0, 1, 1], [], []>} : vector<8x32xbf16>, vector<32x8xbf16>, vector<8x8xf32> -> vector<8x8xf32>
    %8 = vector.broadcast %6 : vector<1x8xf32> to vector<8x8xf32>
    %9 = arith.addf %7, %8 : vector<8x8xf32>
    %cst_8 = arith.constant 0.000000e+00 : f32
    %10 = vector.broadcast %cst_8 : f32 to vector<8x8xf32>
    %11 = arith.maximumf %9, %10 : vector<8x8xf32>
    %12 = arith.truncf %11 : vector<8x8xf32> to vector<8x8xbf16>
    %c1 = arith.constant 1 : index
    %c0_9 = arith.constant 0 : index
    %c0_10 = arith.constant 0 : index
    %13 = vector.load %arg3[%c1, %c0_9, %c0_10] : memref<12x32x128xbf16, #tpu.memory_space<vmem>>, vector<1x8x16xbf16>
    %14 = vector.shape_cast %13 : vector<1x8x16xbf16> to vector<8x16xbf16>
    %c1_11 = arith.constant 1 : index
    %c0_12 = arith.constant 0 : index
    %15 = vector.load %arg5[%c1_11, %c0_12] : memref<12x128xf32, #tpu.memory_space<vmem>>, vector<1x16xf32>
    %cst_13 = arith.constant dense<0.000000e+00> : vector<8x16xf32>
    %16 = tpu.matmul %12, %14, %cst_13 {dimension_numbers = #tpu.dot_dimension_numbers<[1], [0], [0], [1], [0, 0, 1, 1], [], []>} : vector<8x8xbf16>, vector<8x16xbf16>, vector<8x16xf32> -> vector<8x16xf32>
    %17 = vector.broadcast %15 : vector<1x16xf32> to vector<8x16xf32>
    %18 = arith.addf %16, %17 : vector<8x16xf32>
    %cst_14 = arith.constant 0.000000e+00 : f32
    %19 = vector.broadcast %cst_14 : f32 to vector<8x16xf32>
    %20 = arith.maximumf %18, %19 : vector<8x16xf32>
    %21 = arith.truncf %20 : vector<8x16xf32> to vector<8x16xbf16>
    %c2 = arith.constant 2 : index
    %c0_15 = arith.constant 0 : index
    %c0_16 = arith.constant 0 : index
    %22 = vector.load %arg3[%c2, %c0_15, %c0_16] : memref<12x32x128xbf16, #tpu.memory_space<vmem>>, vector<1x16x32xbf16>
    %23 = vector.shape_cast %22 : vector<1x16x32xbf16> to vector<16x32xbf16>
    %c2_17 = arith.constant 2 : index
    %c0_18 = arith.constant 0 : index
    %24 = vector.load %arg5[%c2_17, %c0_18] : memref<12x128xf32, #tpu.memory_space<vmem>>, vector<1x32xf32>
    %cst_19 = arith.constant dense<0.000000e+00> : vector<8x32xf32>
    %25 = tpu.matmul %21, %23, %cst_19 {dimension_numbers = #tpu.dot_dimension_numbers<[1], [0], [0], [1], [0, 0, 1, 1], [], []>} : vector<8x16xbf16>, vector<16x32xbf16>, vector<8x32xf32> -> vector<8x32xf32>
    %26 = vector.broadcast %24 : vector<1x32xf32> to vector<8x32xf32>
    %27 = arith.addf %25, %26 : vector<8x32xf32>
    %cst_20 = arith.constant 0.000000e+00 : f32
    %28 = vector.broadcast %cst_20 : f32 to vector<8x32xf32>
    %29 = arith.maximumf %27, %28 : vector<8x32xf32>
    %30 = arith.truncf %29 : vector<8x32xf32> to vector<8x32xbf16>
    %c3 = arith.constant 3 : index
    %c0_21 = arith.constant 0 : index
    %c0_22 = arith.constant 0 : index
    %31 = vector.load %arg3[%c3, %c0_21, %c0_22] : memref<12x32x128xbf16, #tpu.memory_space<vmem>>, vector<1x32x32xbf16>
    %32 = vector.shape_cast %31 : vector<1x32x32xbf16> to vector<32x32xbf16>
    %c3_23 = arith.constant 3 : index
    %c0_24 = arith.constant 0 : index
    %33 = vector.load %arg5[%c3_23, %c0_24] : memref<12x128xf32, #tpu.memory_space<vmem>>, vector<1x32xf32>
    %cst_25 = arith.constant dense<0.000000e+00> : vector<8x32xf32>
    %34 = tpu.matmul %30, %32, %cst_25 {dimension_numbers = #tpu.dot_dimension_numbers<[1], [0], [0], [1], [0, 0, 1, 1], [], []>} : vector<8x32xbf16>, vector<32x32xbf16>, vector<8x32xf32> -> vector<8x32xf32>
    %35 = vector.broadcast %33 : vector<1x32xf32> to vector<8x32xf32>
    %36 = arith.addf %34, %35 : vector<8x32xf32>
    %37 = arith.truncf %36 : vector<8x32xf32> to vector<8x32xbf16>
    %c4 = arith.constant 4 : index
    %c0_26 = arith.constant 0 : index
    %c0_27 = arith.constant 0 : index
    %38 = vector.load %arg3[%c4, %c0_26, %c0_27] : memref<12x32x128xbf16, #tpu.memory_space<vmem>>, vector<1x32x32xbf16>
    %39 = vector.shape_cast %38 : vector<1x32x32xbf16> to vector<32x32xbf16>
    %c4_28 = arith.constant 4 : index
    %c0_29 = arith.constant 0 : index
    %40 = vector.load %arg5[%c4_28, %c0_29] : memref<12x128xf32, #tpu.memory_space<vmem>>, vector<1x32xf32>
    %cst_30 = arith.constant dense<0.000000e+00> : vector<8x32xf32>
    %41 = tpu.matmul %1, %39, %cst_30 {dimension_numbers = #tpu.dot_dimension_numbers<[1], [0], [0], [1], [0, 0, 1, 1], [], []>} : vector<8x32xbf16>, vector<32x32xbf16>, vector<8x32xf32> -> vector<8x32xf32>
    %42 = vector.broadcast %40 : vector<1x32xf32> to vector<8x32xf32>
    %43 = arith.addf %41, %42 : vector<8x32xf32>
    %cst_31 = arith.constant 0.000000e+00 : f32
    %44 = vector.broadcast %cst_31 : f32 to vector<8x32xf32>
    %45 = arith.maximumf %43, %44 : vector<8x32xf32>
    %46 = arith.truncf %45 : vector<8x32xf32> to vector<8x32xbf16>
    %c5 = arith.constant 5 : index
    %c0_32 = arith.constant 0 : index
    %c0_33 = arith.constant 0 : index
    %47 = vector.load %arg3[%c5, %c0_32, %c0_33] : memref<12x32x128xbf16, #tpu.memory_space<vmem>>, vector<1x32x16xbf16>
    %48 = vector.shape_cast %47 : vector<1x32x16xbf16> to vector<32x16xbf16>
    %c5_34 = arith.constant 5 : index
    %c0_35 = arith.constant 0 : index
    %49 = vector.load %arg5[%c5_34, %c0_35] : memref<12x128xf32, #tpu.memory_space<vmem>>, vector<1x16xf32>
    %cst_36 = arith.constant dense<0.000000e+00> : vector<8x16xf32>
    %50 = tpu.matmul %46, %48, %cst_36 {dimension_numbers = #tpu.dot_dimension_numbers<[1], [0], [0], [1], [0, 0, 1, 1], [], []>} : vector<8x32xbf16>, vector<32x16xbf16>, vector<8x16xf32> -> vector<8x16xf32>
    %51 = vector.broadcast %49 : vector<1x16xf32> to vector<8x16xf32>
    %52 = arith.addf %50, %51 : vector<8x16xf32>
    %cst_37 = arith.constant 0.000000e+00 : f32
    %53 = vector.broadcast %cst_37 : f32 to vector<8x16xf32>
    %54 = arith.maximumf %52, %53 : vector<8x16xf32>
    %55 = arith.truncf %54 : vector<8x16xf32> to vector<8x16xbf16>
    %c6 = arith.constant 6 : index
    %c0_38 = arith.constant 0 : index
    %c0_39 = arith.constant 0 : index
    %56 = vector.load %arg3[%c6, %c0_38, %c0_39] : memref<12x32x128xbf16, #tpu.memory_space<vmem>>, vector<1x16x8xbf16>
    %57 = vector.shape_cast %56 : vector<1x16x8xbf16> to vector<16x8xbf16>
    %c6_40 = arith.constant 6 : index
    %c0_41 = arith.constant 0 : index
    %58 = vector.load %arg5[%c6_40, %c0_41] : memref<12x128xf32, #tpu.memory_space<vmem>>, vector<1x8xf32>
    %cst_42 = arith.constant dense<0.000000e+00> : vector<8x8xf32>
    %59 = tpu.matmul %55, %57, %cst_42 {dimension_numbers = #tpu.dot_dimension_numbers<[1], [0], [0], [1], [0, 0, 1, 1], [], []>} : vector<8x16xbf16>, vector<16x8xbf16>, vector<8x8xf32> -> vector<8x8xf32>
    %60 = vector.broadcast %58 : vector<1x8xf32> to vector<8x8xf32>
    %61 = arith.addf %59, %60 : vector<8x8xf32>
    %cst_43 = arith.constant 0.000000e+00 : f32
    %62 = vector.broadcast %cst_43 : f32 to vector<8x8xf32>
    %63 = arith.maximumf %61, %62 : vector<8x8xf32>
    %64 = arith.truncf %63 : vector<8x8xf32> to vector<8x8xbf16>
    %c7 = arith.constant 7 : index
    %c0_44 = arith.constant 0 : index
    %c0_45 = arith.constant 0 : index
    %65 = vector.load %arg3[%c7, %c0_44, %c0_45] : memref<12x32x128xbf16, #tpu.memory_space<vmem>>, vector<1x8x32xbf16>
    %66 = vector.shape_cast %65 : vector<1x8x32xbf16> to vector<8x32xbf16>
    %c7_46 = arith.constant 7 : index
    %c0_47 = arith.constant 0 : index
    %67 = vector.load %arg5[%c7_46, %c0_47] : memref<12x128xf32, #tpu.memory_space<vmem>>, vector<1x32xf32>
    %cst_48 = arith.constant dense<0.000000e+00> : vector<8x32xf32>
    %68 = tpu.matmul %64, %66, %cst_48 {dimension_numbers = #tpu.dot_dimension_numbers<[1], [0], [0], [1], [0, 0, 1, 1], [], []>} : vector<8x8xbf16>, vector<8x32xbf16>, vector<8x32xf32> -> vector<8x32xf32>
    %69 = vector.broadcast %67 : vector<1x32xf32> to vector<8x32xf32>
    %70 = arith.addf %68, %69 : vector<8x32xf32>
    %71 = arith.truncf %70 : vector<8x32xf32> to vector<8x32xbf16>
    %c8 = arith.constant 8 : index
    %c0_49 = arith.constant 0 : index
    %c0_50 = arith.constant 0 : index
    %72 = vector.load %arg3[%c8, %c0_49, %c0_50] : memref<12x32x128xbf16, #tpu.memory_space<vmem>>, vector<1x32x32xbf16>
    %73 = vector.shape_cast %72 : vector<1x32x32xbf16> to vector<32x32xbf16>
    %cst_51 = arith.constant dense<0.000000e+00> : vector<8x32xf32>
    %74 = tpu.matmul %1, %73, %cst_51 {dimension_numbers = #tpu.dot_dimension_numbers<[1], [0], [0], [1], [0, 0, 1, 1], [], []>} : vector<8x32xbf16>, vector<32x32xbf16>, vector<8x32xf32> -> vector<8x32xf32>
    %c9 = arith.constant 9 : index
    %c0_52 = arith.constant 0 : index
    %c0_53 = arith.constant 0 : index
    %75 = vector.load %arg3[%c9, %c0_52, %c0_53] : memref<12x32x128xbf16, #tpu.memory_space<vmem>>, vector<1x32x32xbf16>
    %76 = vector.shape_cast %75 : vector<1x32x32xbf16> to vector<32x32xbf16>
    %cst_54 = arith.constant dense<0.000000e+00> : vector<8x32xf32>
    %77 = tpu.matmul %71, %76, %cst_54 {dimension_numbers = #tpu.dot_dimension_numbers<[1], [0], [0], [1], [0, 0, 1, 1], [], []>} : vector<8x32xbf16>, vector<32x32xbf16>, vector<8x32xf32> -> vector<8x32xf32>
    %78 = arith.addf %74, %77 : vector<8x32xf32>
    %c8_55 = arith.constant 8 : index
    %c0_56 = arith.constant 0 : index
    %79 = vector.load %arg5[%c8_55, %c0_56] : memref<12x128xf32, #tpu.memory_space<vmem>>, vector<1x32xf32>
    %80 = vector.broadcast %79 : vector<1x32xf32> to vector<8x32xf32>
    %81 = arith.addf %78, %80 : vector<8x32xf32>
    %cst_57 = arith.constant 0.000000e+00 : f32
    %82 = vector.broadcast %cst_57 : f32 to vector<8x32xf32>
    %83 = arith.maximumf %81, %82 : vector<8x32xf32>
    %84 = arith.truncf %83 : vector<8x32xf32> to vector<8x32xbf16>
    %c10 = arith.constant 10 : index
    %c0_58 = arith.constant 0 : index
    %c0_59 = arith.constant 0 : index
    %85 = vector.load %arg3[%c10, %c0_58, %c0_59] : memref<12x32x128xbf16, #tpu.memory_space<vmem>>, vector<1x32x16xbf16>
    %86 = vector.shape_cast %85 : vector<1x32x16xbf16> to vector<32x16xbf16>
    %c9_60 = arith.constant 9 : index
    %c0_61 = arith.constant 0 : index
    %87 = vector.load %arg5[%c9_60, %c0_61] : memref<12x128xf32, #tpu.memory_space<vmem>>, vector<1x16xf32>
    %cst_62 = arith.constant dense<0.000000e+00> : vector<8x16xf32>
    %88 = tpu.matmul %84, %86, %cst_62 {dimension_numbers = #tpu.dot_dimension_numbers<[1], [0], [0], [1], [0, 0, 1, 1], [], []>} : vector<8x32xbf16>, vector<32x16xbf16>, vector<8x16xf32> -> vector<8x16xf32>
    %89 = vector.broadcast %87 : vector<1x16xf32> to vector<8x16xf32>
    %90 = arith.addf %88, %89 : vector<8x16xf32>
    %cst_63 = arith.constant 0.000000e+00 : f32
    %91 = vector.broadcast %cst_63 : f32 to vector<8x16xf32>
    %92 = arith.maximumf %90, %91 : vector<8x16xf32>
    %93 = arith.truncf %92 : vector<8x16xf32> to vector<8x16xbf16>
    %c11 = arith.constant 11 : index
    %c0_64 = arith.constant 0 : index
    %c0_65 = arith.constant 0 : index
    %94 = vector.load %arg3[%c11, %c0_64, %c0_65] : memref<12x32x128xbf16, #tpu.memory_space<vmem>>, vector<1x16x8xbf16>
    %95 = vector.shape_cast %94 : vector<1x16x8xbf16> to vector<16x8xbf16>
    %c10_66 = arith.constant 10 : index
    %c0_67 = arith.constant 0 : index
    %96 = vector.load %arg5[%c10_66, %c0_67] : memref<12x128xf32, #tpu.memory_space<vmem>>, vector<1x8xf32>
    %cst_68 = arith.constant dense<0.000000e+00> : vector<8x8xf32>
    %97 = tpu.matmul %93, %95, %cst_68 {dimension_numbers = #tpu.dot_dimension_numbers<[1], [0], [0], [1], [0, 0, 1, 1], [], []>} : vector<8x16xbf16>, vector<16x8xbf16>, vector<8x8xf32> -> vector<8x8xf32>
    %98 = vector.broadcast %96 : vector<1x8xf32> to vector<8x8xf32>
    %99 = arith.addf %97, %98 : vector<8x8xf32>
    %cst_69 = arith.constant 0.000000e+00 : f32
    %100 = vector.broadcast %cst_69 : f32 to vector<8x8xf32>
    %101 = arith.maximumf %99, %100 : vector<8x8xf32>
    %c8_70 = arith.constant 8 : index
    %c0_71 = arith.constant 0 : index
    %c0_72 = arith.constant 0 : index
    %102 = vector.load %arg3[%c8_70, %c0_71, %c0_72] : memref<12x32x128xbf16, #tpu.memory_space<vmem>>, vector<1x32x32xbf16>
    %103 = vector.shape_cast %102 : vector<1x32x32xbf16> to vector<32x32xbf16>
    %cst_73 = arith.constant dense<0.000000e+00> : vector<8x32xf32>
    %104 = tpu.matmul %37, %103, %cst_73 {dimension_numbers = #tpu.dot_dimension_numbers<[1], [0], [0], [1], [0, 0, 1, 1], [], []>} : vector<8x32xbf16>, vector<32x32xbf16>, vector<8x32xf32> -> vector<8x32xf32>
    %c9_74 = arith.constant 9 : index
    %c0_75 = arith.constant 0 : index
    %c0_76 = arith.constant 0 : index
    %105 = vector.load %arg3[%c9_74, %c0_75, %c0_76] : memref<12x32x128xbf16, #tpu.memory_space<vmem>>, vector<1x32x32xbf16>
    %106 = vector.shape_cast %105 : vector<1x32x32xbf16> to vector<32x32xbf16>
    %cst_77 = arith.constant dense<0.000000e+00> : vector<8x32xf32>
    %107 = tpu.matmul %3, %106, %cst_77 {dimension_numbers = #tpu.dot_dimension_numbers<[1], [0], [0], [1], [0, 0, 1, 1], [], []>} : vector<8x32xbf16>, vector<32x32xbf16>, vector<8x32xf32> -> vector<8x32xf32>
    %108 = arith.addf %104, %107 : vector<8x32xf32>
    %c8_78 = arith.constant 8 : index
    %c0_79 = arith.constant 0 : index
    %109 = vector.load %arg5[%c8_78, %c0_79] : memref<12x128xf32, #tpu.memory_space<vmem>>, vector<1x32xf32>
    %110 = vector.broadcast %109 : vector<1x32xf32> to vector<8x32xf32>
    %111 = arith.addf %108, %110 : vector<8x32xf32>
    %cst_80 = arith.constant 0.000000e+00 : f32
    %112 = vector.broadcast %cst_80 : f32 to vector<8x32xf32>
    %113 = arith.maximumf %111, %112 : vector<8x32xf32>
    %114 = arith.truncf %113 : vector<8x32xf32> to vector<8x32xbf16>
    %c10_81 = arith.constant 10 : index
    %c0_82 = arith.constant 0 : index
    %c0_83 = arith.constant 0 : index
    %115 = vector.load %arg3[%c10_81, %c0_82, %c0_83] : memref<12x32x128xbf16, #tpu.memory_space<vmem>>, vector<1x32x16xbf16>
    %116 = vector.shape_cast %115 : vector<1x32x16xbf16> to vector<32x16xbf16>
    %c9_84 = arith.constant 9 : index
    %c0_85 = arith.constant 0 : index
    %117 = vector.load %arg5[%c9_84, %c0_85] : memref<12x128xf32, #tpu.memory_space<vmem>>, vector<1x16xf32>
    %cst_86 = arith.constant dense<0.000000e+00> : vector<8x16xf32>
    %118 = tpu.matmul %114, %116, %cst_86 {dimension_numbers = #tpu.dot_dimension_numbers<[1], [0], [0], [1], [0, 0, 1, 1], [], []>} : vector<8x32xbf16>, vector<32x16xbf16>, vector<8x16xf32> -> vector<8x16xf32>
    %119 = vector.broadcast %117 : vector<1x16xf32> to vector<8x16xf32>
    %120 = arith.addf %118, %119 : vector<8x16xf32>
    %cst_87 = arith.constant 0.000000e+00 : f32
    %121 = vector.broadcast %cst_87 : f32 to vector<8x16xf32>
    %122 = arith.maximumf %120, %121 : vector<8x16xf32>
    %123 = arith.truncf %122 : vector<8x16xf32> to vector<8x16xbf16>
    %c11_88 = arith.constant 11 : index
    %c0_89 = arith.constant 0 : index
    %c0_90 = arith.constant 0 : index
    %124 = vector.load %arg3[%c11_88, %c0_89, %c0_90] : memref<12x32x128xbf16, #tpu.memory_space<vmem>>, vector<1x16x8xbf16>
    %125 = vector.shape_cast %124 : vector<1x16x8xbf16> to vector<16x8xbf16>
    %c10_91 = arith.constant 10 : index
    %c0_92 = arith.constant 0 : index
    %126 = vector.load %arg5[%c10_91, %c0_92] : memref<12x128xf32, #tpu.memory_space<vmem>>, vector<1x8xf32>
    %cst_93 = arith.constant dense<0.000000e+00> : vector<8x8xf32>
    %127 = tpu.matmul %123, %125, %cst_93 {dimension_numbers = #tpu.dot_dimension_numbers<[1], [0], [0], [1], [0, 0, 1, 1], [], []>} : vector<8x16xbf16>, vector<16x8xbf16>, vector<8x8xf32> -> vector<8x8xf32>
    %128 = vector.broadcast %126 : vector<1x8xf32> to vector<8x8xf32>
    %129 = arith.addf %127, %128 : vector<8x8xf32>
    %cst_94 = arith.constant 0.000000e+00 : f32
    %130 = vector.broadcast %cst_94 : f32 to vector<8x8xf32>
    %131 = arith.maximumf %129, %130 : vector<8x8xf32>
    %c0_95 = arith.constant 0 : index
    %c0_96 = arith.constant 0 : index
    %c0_97 = arith.constant 0 : index
    %132 = vector.load %arg4[%c0_95, %c0_96, %c0_97] : memref<2x8x8xf32, #tpu.memory_space<vmem>>, vector<1x8x8xf32>
    %133 = vector.shape_cast %132 : vector<1x8x8xf32> to vector<8x8xf32>
    %cst_98 = arith.constant dense<0.000000e+00> : vector<8x8xf32>
    %134 = tpu.matmul %101, %133, %cst_98 {dimension_numbers = #tpu.dot_dimension_numbers<[1], [0], [0], [1], [0, 0, 1, 1], [], []>} : vector<8x8xf32>, vector<8x8xf32>, vector<8x8xf32> -> vector<8x8xf32>
    %c1_99 = arith.constant 1 : index
    %c0_100 = arith.constant 0 : index
    %c0_101 = arith.constant 0 : index
    %135 = vector.load %arg4[%c1_99, %c0_100, %c0_101] : memref<2x8x8xf32, #tpu.memory_space<vmem>>, vector<1x8x8xf32>
    %136 = vector.shape_cast %135 : vector<1x8x8xf32> to vector<8x8xf32>
    %cst_102 = arith.constant dense<0.000000e+00> : vector<8x8xf32>
    %137 = tpu.matmul %131, %136, %cst_102 {dimension_numbers = #tpu.dot_dimension_numbers<[1], [0], [0], [1], [0, 0, 1, 1], [], []>} : vector<8x8xf32>, vector<8x8xf32>, vector<8x8xf32> -> vector<8x8xf32>
    %138 = arith.addf %134, %137 : vector<8x8xf32>
    %c11_103 = arith.constant 11 : index
    %c0_104 = arith.constant 0 : index
    %139 = vector.load %arg5[%c11_103, %c0_104] : memref<12x128xf32, #tpu.memory_space<vmem>>, vector<1x8xf32>
    %140 = vector.broadcast %139 : vector<1x8xf32> to vector<8x8xf32>
    %141 = arith.addf %138, %140 : vector<8x8xf32>
    %cst_105 = arith.constant 0.000000e+00 : f32
    %142 = vector.broadcast %cst_105 : f32 to vector<8x8xf32>
    %143 = arith.subf %142, %141 : vector<8x8xf32>
    %144 = math.exp %143 : vector<8x8xf32>
    %cst_106 = arith.constant 1.000000e+00 : f32
    %145 = vector.broadcast %cst_106 : f32 to vector<8x8xf32>
    %146 = arith.addf %145, %144 : vector<8x8xf32>
    %147 = tpu.reciprocal %146 {approx = true} : vector<8x8xf32> -> vector<8x8xf32>
    %c0_107 = arith.constant 0 : index
    %c0_108 = arith.constant 0 : index
    %148 = vector.load %arg6[%c0_107, %c0_108] : memref<8x8xf32, #tpu.memory_space<vmem>>, vector<8x8xf32>
    tpu.vector_store %arg6[%c0_107, %c0_108], %147 {strides = array<i32>} : memref<8x8xf32, #tpu.memory_space<vmem>>, vector<8x8xf32>,
    return
  }
  func.func @transform_0(%arg0: i32) -> (i32, i32) {
    %c0_i32 = arith.constant 0 : i32
    %c0_i32_0 = arith.constant 0 : i32
    return %arg0, %c0_i32 : i32, i32
  }
  func.func @transform_1(%arg0: i32) -> (i32, i32) {
    %c0_i32 = arith.constant 0 : i32
    %c0_i32_0 = arith.constant 0 : i32
    return %arg0, %c0_i32 : i32, i32
  }
  func.func @transform_2(%arg0: i32) -> (i32, i32, i32) {
    %c0_i32 = arith.constant 0 : i32
    %c0_i32_0 = arith.constant 0 : i32
    %c0_i32_1 = arith.constant 0 : i32
    %c0_i32_2 = arith.constant 0 : i32
    return %c0_i32, %c0_i32_0, %c0_i32_1 : i32, i32, i32
  }
  func.func @transform_3(%arg0: i32) -> (i32, i32, i32) {
    %c0_i32 = arith.constant 0 : i32
    %c0_i32_0 = arith.constant 0 : i32
    %c0_i32_1 = arith.constant 0 : i32
    %c0_i32_2 = arith.constant 0 : i32
    return %c0_i32, %c0_i32_0, %c0_i32_1 : i32, i32, i32
  }
  func.func @transform_4(%arg0: i32) -> (i32, i32) {
    %c0_i32 = arith.constant 0 : i32
    %c0_i32_0 = arith.constant 0 : i32
    %c0_i32_1 = arith.constant 0 : i32
    return %c0_i32, %c0_i32_0 : i32, i32
  }
  func.func @transform_5(%arg0: i32) -> (i32, i32) {
    %c0_i32 = arith.constant 0 : i32
    %c0_i32_0 = arith.constant 0 : i32
    return %arg0, %c0_i32 : i32, i32
  }
}

</mosaic_0001>

<bundles_post_ra>
// kernel: tpu_custom_call.1
= control target key start
LH: loop header
LB: loop body
LE: loop exit
PB: predicated region body
PF: predicated region fallthrough
CT: control target
= control target key end

     0   :  { %10 = vsyncpa [#allocation3], 0  ;;  %s1820_s0 = inlined_call_operand.hbm [shape: f32[8,32], index: 0, kind: input, shape index: {}]   ;;  %s1821_s1 = inlined_call_operand.hbm [shape: f32[8,32], index: 1, kind: input, shape index: {}]   ;;  %s1822_s2 = inlined_call_operand.hbm [shape: bf16[12,32,128], index: 2, kind: input, shape index: {}]   ;;  %s1823_s3 = inlined_call_operand.hbm [shape: f32[2,8,8], index: 3, kind: input, shape index: {}]   ;;  %s1824_s4 = inlined_call_operand.hbm [shape: f32[12,128], index: 4, kind: input, shape index: {}]   ;;  %s1825_s5 = inlined_call_operand.hbm [shape: f32[8,8], index: 5, kind: output, shape index: {}]  }
   0x1   :  { %11 = vsyncpa [#allocation6], 0 }
   0x2   :  { %12 = vsyncpa [#allocation9], 0 }
   0x3   :  { %13 = vsyncpa [#allocation4], 0  ;;  %s1582_s18 = smov [#allocation5]   ;;  %s1583_s20 = smov [#allocation8]  }
   0x4   :  { %s30_s19 = sshll.u32 %s1582_s18, 4  ;;  %s51_s21 = sshll.u32 %s1583_s20, 4  ;;  %s31_s19 = int_to_ptr.vmem [resolvable:$true] %s30_s19  ;;  %s1624_s21 = int_to_ptr.vmem [resolvable:$true] %s51_s21 }
   0x5   :  { %s1442_s24 = scalar_lea.hbm %s1821_s1, 128 }
   0x6   :  { %p1443_p0 = scmp.ne.s32.totalorder %s1821_s1, %s1442_s24  ;;  %p1446_p1 = scmp.lt.u32.totalorder %s1442_s24, %s1821_s1 }
   0x8   :  { %p1448_p2 = pnand %p1446_p1, %p1443_p0 }
   0xa   :  { %1451 = shalt.err (!%p1448_p2)
}
   0xb   :  { %s1452_s29 = scalar_lea.vmem %s31_s19, 128  ;;  %p1457_p4 = scmp.lt.s32.totalorder %s31_s19, %s31_s19 }
   0xc   :  { %p1453_p3 = scmp.ne.s32.totalorder %s31_s19, %s1452_s29  ;;  %p1458_p5 = scmp.lt.s32.totalorder %s1452_s29, %s1452_s29 }
   0xe   :  { %p1459_p6 = por %p1458_p5, %p1457_p4 }
  0x10   :  { %p1460_p7 = pnand %p1459_p6, %p1453_p3 }
  0x12   :  { %1463 = shalt.err (!%p1460_p7)
}
  0x13   :  { %33 = dma.hbm_to_vmem [thread:$0]  %s1821_s1, 128, %s31_s19, [#allocation6]  }
  0x14   :  { %s1464_s9 = scalar_lea.hbm %s1823_s3, 256 }
  0x15   :  { %p1465_p8 = scmp.ne.s32.totalorder %s1823_s3, %s1464_s9  ;;  %p1468_p9 = scmp.lt.u32.totalorder %s1464_s9, %s1823_s3 }
  0x17   :  { %p1470_p10 = pnand %p1468_p9, %p1465_p8 }
  0x19   :  { %1473 = shalt.err (!%p1470_p10)
}
  0x1a   :  { %s1474_s14 = scalar_lea.vmem %s1624_s21, 256  ;;  %p1479_p12 = scmp.lt.s32.totalorder %s1624_s21, %s1624_s21 }
  0x1b   :  { %p1475_p11 = scmp.ne.s32.totalorder %s1624_s21, %s1474_s14  ;;  %p1480_p13 = scmp.lt.s32.totalorder %s1474_s14, %s1474_s14 }
  0x1d   :  { %p1481_p0 = por %p1480_p13, %p1479_p12 }
  0x1f   :  { %p1482_p1 = pnand %p1481_p0, %p1475_p11 }
  0x21   :  { %1485 = shalt.err (!%p1482_p1)
}
  0x22   :  { %s1584_s1 = smov 128   ;;  %s1585_s15 = smov 8  }
  0x23   :  { %57 = dma.hbm_to_vmem [thread:$0]  %s1823_s3, 256, %s1624_s21, [#allocation9], %s1584_s1, %s1584_s1, %s1585_s15  }
  0x24   :  { %s1586_s18 = smov [#allocation2]   ;;  %s1587_s20 = smov [#allocation7]  }
  0x25   :  { %s20_s19 = sshll.u32 %s1586_s18, 4  ;;  %s39_s22 = sshll.u32 %s1587_s20, 4  ;;  %s21_s19 = int_to_ptr.vmem [resolvable:$true] %s20_s19  ;;  %s1658_s22 = int_to_ptr.vmem [resolvable:$true] %s39_s22 }
  0x26   :  { %s1486_s25 = scalar_lea.hbm %s1820_s0, 128 }
  0x27   :  { %p1487_p2 = scmp.ne.s32.totalorder %s1820_s0, %s1486_s25  ;;  %p1490_p3 = scmp.lt.u32.totalorder %s1486_s25, %s1820_s0 }
  0x29   :  { %p1492_p4 = pnand %p1490_p3, %p1487_p2 }
  0x2b   :  { %1495 = shalt.err (!%p1492_p4)
}
  0x2c   :  { %s1496_s3 = scalar_lea.vmem %s21_s19, 128  ;;  %p1501_p6 = scmp.lt.s32.totalorder %s21_s19, %s21_s19 }
  0x2d   :  { %p1497_p5 = scmp.ne.s32.totalorder %s21_s19, %s1496_s3  ;;  %p1502_p7 = scmp.lt.s32.totalorder %s1496_s3, %s1496_s3 }
  0x2f   :  { %p1503_p8 = por %p1502_p7, %p1501_p6 }
  0x31   :  { %p1504_p9 = pnand %p1503_p8, %p1497_p5 }
  0x33   :  { %1507 = shalt.err (!%p1504_p9)
}
  0x34   :  { %23 = dma.hbm_to_vmem [thread:$0]  %s1820_s0, 128, %s21_s19, [#allocation3]  }
  0x35   :  { %s1508_s8 = scalar_lea.hbm %s1822_s2, 3072 }
  0x36   :  { %p1509_p10 = scmp.ne.s32.totalorder %s1822_s2, %s1508_s8  ;;  %p1512_p11 = scmp.lt.u32.totalorder %s1508_s8, %s1822_s2 }
  0x38   :  { %p1514_p12 = pnand %p1512_p11, %p1509_p10 }
  0x3a   :  { %1517 = shalt.err (!%p1514_p12)
}
  0x3b   :  { %s1518_s13 = scalar_lea.vmem %s1658_s22, 3072  ;;  %p1523_p0 = scmp.lt.s32.totalorder %s1658_s22, %s1658_s22 }
  0x3c   :  { %p1519_p13 = scmp.ne.s32.totalorder %s1658_s22, %s1518_s13  ;;  %p1524_p1 = scmp.lt.s32.totalorder %s1518_s13, %s1518_s13 }
  0x3e   :  { %p1525_p2 = por %p1524_p1, %p1523_p0 }
  0x40   :  { %p1526_p3 = pnand %p1525_p2, %p1519_p13 }
  0x42   :  { %1529 = shalt.err (!%p1526_p3)
}
  0x43   :  { %s1588_s0 = smov 64   ;;  %s1589_s14 = smov 4  }
  0x44   :  { %45 = dma.hbm_to_vmem [thread:$0]  %s1822_s2, 3072, %s1658_s22, [#allocation6], %s1588_s0, %s1588_s0, %s1589_s14  }
  0x45   :  { %s1590_s18 = smov [#allocation10]   ;;  %s1530_s24 = scalar_lea.hbm %s1824_s4, 256 }
  0x46   :  { %s63_s19 = sshll.u32 %s1590_s18, 4  ;;  %p1531_p4 = scmp.ne.s32.totalorder %s1824_s4, %s1530_s24  ;;  %s64_s19 = int_to_ptr.vmem [resolvable:$true] %s63_s19 }
  0x47   :  { %p1534_p5 = scmp.lt.u32.totalorder %s1530_s24, %s1824_s4 }
  0x49   :  { %p1536_p6 = pnand %p1534_p5, %p1531_p4 }
  0x4b   :  { %1539 = shalt.err (!%p1536_p6)
}
  0x4c   :  { %s1540_s29 = scalar_lea.vmem %s64_s19, 256  ;;  %p1545_p8 = scmp.lt.s32.totalorder %s64_s19, %s64_s19 }
  0x4d   :  { %p1541_p7 = scmp.ne.s32.totalorder %s64_s19, %s1540_s29  ;;  %p1546_p9 = scmp.lt.s32.totalorder %s1540_s29, %s1540_s29 }
  0x4f   :  { %p1547_p10 = por %p1546_p9, %p1545_p8 }
  0x51   :  { %p1548_p11 = pnand %p1547_p10, %p1541_p7 }
  0x53   :  { %1551 = shalt.err (!%p1548_p11)
}
  0x54   :  { %69 = dma.hbm_to_vmem [thread:$0]  %s1824_s4, 256, %s64_s19, [#allocation9], %s1584_s1, %s1584_s1, %s1585_s15  }
  0x55   :  { %1574 = dma.done.wait [#allocation3], 128  }
  0x56   :  { %1575 = vsyncadd [#allocation3], 4294967168 }
  0x57   :  { %1576 = dma.done.wait [#allocation6], 3200  }
  0x58   :  { %1577 = vsyncadd [#allocation6], 4294964096 }
  0x59   :  { %1578 = dma.done.wait [#allocation9], 512  }
  0x5a   :  { %1579 = vsyncadd [#allocation9], 4294966784  ;;  %v1591_v0 = vmov 0.0   ;;  %vm1592_vm0 = vmmov 0   ;;  %v1421_v1 = vld [vmem:[#allocation7] sm:$0xff]   ;;  %v1422_v2 = vld [vmem:[#allocation7 + $0x8] sm:$0xff]  }
  0x5b   :  { %1283 = vmatprep.subr.bf16.mxu0 %v1591_v0  ;;  %1287 = vmatprep.mubr.msk.bf16.mxu0 %vm1592_vm0, %v1591_v0  ;;  %v88_v3 = vld [vmem:[#allocation5] sm:$0xff]  ;;  %vm111_vm1 = vcmask 261120   ;;  %v158_v5 = vld [vmem:[#allocation7 + $0x10] sm:$0xf]  ;;  %vm168_vm2 = vcmask 1043456   ;;  %vm164_vm3 = vcmask 64512  }
  0x5c   :  { %1291 = vmatprep.subr.bf16.mxu1 %v1591_v0  ;;  %1293 = vmatprep.mubr.msk.bf16.mxu1 %vm1592_vm0, %v1591_v0  ;;  %v1711_v4 = vpack.c.bf16 %v88_v3, %v88_v3  ;;  %v170_v6 = vsel %vm168_vm2, %v158_v5, 0  ;;  %v1190_v7 = vld [vmem:[#allocation10] ss:$0 sm:$0xff]  ;;  %v1423_v14 = vld [vmem:[#allocation7 + $0x20] sm:$0xff]   ;;  %v1194_v17 = vld [vmem:[#allocation10 + $0x1] ss:$0 sm:$0xff] }
  0x5d   :  { %1284 = vmatpush3.bf16.msra.mxu0 %v1421_v1  ;;  %1292 = vmatpush3.bf16.msra.mxu1 %v170_v6  ;;  %v1426_v16 = vld [vmem:[#allocation7 + $0x30] sm:$0xff]   ;;  %vm228_vm4 = vcmask 130048   ;;  %v1424_v24 = vld [vmem:[#allocation7 + $0x40] sm:$0xff]   ;;  %v1425_v26 = vld [vmem:[#allocation7 + $0x48] sm:$0xff]   ;;  %s1593_s4 = smov [#allocation11]  }
  0x5e   :  { %1285 = vmatprep.subr.bf16.mxu0 %v1591_v0  ;;  %1297 = vmatprep.subr.bf16.mxu1 %v1591_v0  ;;  %v86_v27 = vld [vmem:[#allocation2] sm:$0xff]  ;;  %v1427_v29 = vld [vmem:[#allocation7 + $0x38] sm:$0xff]   ;;  %v1430_v50 = vld [vmem:[#allocation7 + $0x60] sm:$0xff]   ;;  %s1179_s1 = sshll.u32 %s1593_s4, 4  ;;  %s1180_s1 = int_to_ptr.vmem [resolvable:$true] %s1179_s1 }
  0x5f   :  { %v1729_v28 = vpack.c.bf16 %v86_v27, %v86_v27  ;;  %v1196_v30 = vld [vmem:[#allocation10 + $0x2] ss:$0 sm:$0xff]  ;;  %v1203_v39 = vld [vmem:[#allocation10 + $0x4] ss:$0 sm:$0xff]  ;;  %v1429_v41 = vld [vmem:[#allocation7 + $0x58] sm:$0xff]   ;;  %s1552_s15 = scalar_lea.vmem %s1180_s1, 128  ;;  %p1557_p13 = scmp.lt.s32.totalorder %s1180_s1, %s1180_s1 }
  0x60   :  { %v1428_v37 = vld [vmem:[#allocation7 + $0x50] sm:$0xff]   ;;  %p1553_p12 = scmp.ne.s32.totalorder %s1180_s1, %s1552_s15  ;;  %p1558_p0 = scmp.lt.s32.totalorder %s1552_s15, %s1552_s15 }
  0x61   :  { %1286 = vmatpush3.bf16.msra.mxu0 %v1422_v2  ;;  %v534_v44 = vld [vmem:[#allocation7 + $0x70] sm:$0xf]  ;;  %v1207_v55 = vld [vmem:[#allocation10 + $0x5] ss:$0 sm:$0xff]  ;;  %v1211_v1 = vld [vmem:[#allocation10 + $0x6] ss:$0 sm:$0xff] }
  0x62   :  { %1303 = vmatprep.subr.bf16.mxu0 %v1591_v0  ;;  %v544_v48 = vsel %vm168_vm2, %v534_v44, 0  ;;  %v1432_v63 = vld [vmem:[#allocation7 + $0x90] sm:$0xff]   ;;  %p1559_p1 = por %p1558_p0, %p1557_p13 }
  0x63   :  { %v1199_v44 = vld [vmem:[#allocation10 + $0x3] ss:$0 sm:$0xff] }
  0x64   :  { %1288 = vmatmul.mubr.msk.bf16.vlgmr.msra.gmra.mrb[0].mxu0 %vm111_vm1, %v1711_v4  ;;  %p1560_p2 = pnand %p1559_p1, %p1553_p12 }
  0x65   :  { %1307 = vmatprep.mubr.msk.bf16.mxu0 %vm1592_vm0, %v1591_v0  ;;  %1304 = vmatpush3.bf16.msra.mxu0 %v1426_v16 }
  0x66   :  { %1305 = vmatprep.subr.bf16.mxu0 %v1591_v0 }
  0x69   :  { %1306 = vmatpush3.bf16.msra.mxu0 %v1427_v29 }
  0x6a   :  { %1319 = vmatprep.subr.bf16.mxu0 %v1591_v0 }
 0x137   :  { %v149_v8 = vpop.f32.mrb[0].mxu0 }
 0x138   :  { %v150_v9 = vadd.f32 %v1190_v7, %v149_v8  ;;  %v1289_v10 = vpop.f32.mrb[1].mxu0 }
 0x139   :  { %v152_v11 = vpop.f32.mrb[2].mxu0 }
 0x13a   :  { %v155_v12 = vmax.f32 %v150_v9, 0.0  ;;  %v1290_v13 = vpop.f32.mrb[3].mxu0  ;;  %v1754_v9 = vld [vmem:[#allocation7 + $0x80] sm:$0xff]   ;;  %v1758_v11 = vld [vmem:[#allocation7 + $0x88] sm:$0xff]  }
 0x13b   :  { %v1214_v13 = vld [vmem:[#allocation10 + $0x7] ss:$0 sm:$0xff] }
 0x13c   :  { %v156_v15 = vpack.c.bf16 %v155_v12, %v155_v12  ;;  %v1434_v12 = vld [vmem:[#allocation7 + $0x98] sm:$0xff]  }
 0x13e   :  { %1294 = vmatmul.mubr.msk.bf16.vlgmr.msra.gmra.mrb[0].mxu1 %vm164_vm3, %v156_v15 }
 0x13f   :  { %1298 = vmatpush3.bf16.msra.mxu1 %v1423_v14  ;;  %1299 = vmatprep.mubr.msk.bf16.mxu1 %vm1592_vm0, %v1591_v0 }
 0x140   :  { %1311 = vmatprep.subr.bf16.mxu1 %v1591_v0 }
 0x211   :  { %v206_v18 = vpop.f32.mrb[0].mxu1 }
 0x212   :  { %v207_v19 = vadd.f32 %v1194_v17, %v206_v18  ;;  %v1295_v20 = vpop.f32.mrb[1].mxu1 }
 0x213   :  { %v209_v21 = vpop.f32.mrb[2].mxu1 }
 0x214   :  { %v212_v22 = vmax.f32 %v207_v19, 0.0  ;;  %v1296_v23 = vpop.f32.mrb[3].mxu1 }
 0x216   :  { %v213_v25 = vpack.c.bf16 %v212_v22, %v212_v22 }
 0x218   :  { %1300 = vmatmul.mubr.msk.bf16.vlgmr.msra.gmra.mrb[4].mxu1 %vm228_vm4, %v213_v25  ;;  %v1436_v25 = vld [vmem:[#allocation7 + $0xa8] sm:$0xff]  }
 0x219   :  { %1312 = vmatpush3.bf16.msra.mxu1 %v1424_v24  ;;  %1315 = vmatprep.mubr.msk.bf16.mxu1 %vm1592_vm0, %v1591_v0  ;;  %v1435_v24 = vld [vmem:[#allocation7 + $0xa0] sm:$0xff]  }
 0x21a   :  { %1313 = vmatprep.subr.bf16.mxu1 %v1591_v0 }
 0x21d   :  { %1314 = vmatpush3.bf16.msra.mxu1 %v1425_v26  ;;  %v1437_v26 = vld [vmem:[#allocation7 + $0xb0] sm:$0xff]  }
 0x21e   :  { %1327 = vmatprep.subr.bf16.mxu1 %v1591_v0 }
 0x220   :  { %1316 = vmatmul.mubr.msk.bf16.vlgmr.msra.gmra.mrb[8].mxu1 %vm111_vm1, %v1729_v28 }
 0x221   :  { %1329 = vmatprep.mubr.msk.bf16.mxu1 %vm1592_vm0, %v1591_v0  ;;  %1328 = vmatpush3.bf16.msra.mxu1 %v1430_v50 }
 0x222   :  { %1339 = vmatprep.subr.bf16.mxu1 %v1591_v0 }
 0x2eb   :  { %v266_v31 = vpop.f32.mrb[4].mxu1 }
 0x2ec   :  { %v267_v32 = vadd.f32 %v1196_v30, %v266_v31  ;;  %v1301_v33 = vpop.f32.mrb[5].mxu1 }
 0x2ed   :  { %v269_v34 = vpop.f32.mrb[6].mxu1 }
 0x2ee   :  { %v272_v35 = vmax.f32 %v267_v32, 0.0  ;;  %v1302_v36 = vpop.f32.mrb[7].mxu1 }
 0x2ef   :  { %v1223_v36 = vld [vmem:[#allocation10 + $0x9] ss:$0 sm:$0xff] }
 0x2f0   :  { %v273_v38 = vpack.c.bf16 %v272_v35, %v272_v35 }
 0x2f2   :  { %1308 = vmatmul.mubr.msk.bf16.vlgmr.msra.gmra.mrb[4].mxu0 %vm111_vm1, %v273_v38 }
 0x2f3   :  { %1320 = vmatpush3.bf16.msra.mxu0 %v1428_v37  ;;  %v399_v40 = vpop.f32.mrb[8].mxu1  ;;  %1323 = vmatprep.mubr.msk.bf16.mxu0 %vm1592_vm0, %v1591_v0 }
 0x2f4   :  { %v400_v42 = vadd.f32 %v1203_v39, %v399_v40  ;;  %v1317_v43 = vpop.f32.mrb[9].mxu1  ;;  %1321 = vmatprep.subr.bf16.mxu0 %v1591_v0 }
 0x2f5   :  { %v402_v45 = vpop.f32.mrb[10].mxu1 }
 0x2f6   :  { %v405_v46 = vmax.f32 %v400_v42, 0.0  ;;  %v1318_v47 = vpop.f32.mrb[11].mxu1 }
 0x2f7   :  { %1322 = vmatpush3.bf16.msra.mxu0 %v1429_v41 }
 0x2f8   :  { %v406_v49 = vpack.c.bf16 %v405_v46, %v405_v46  ;;  %1333 = vmatprep.subr.bf16.mxu0 %v1591_v0 }
 0x2fa   :  { %1324 = vmatmul.mubr.msk.bf16.vlgmr.msra.gmra.mrb[8].mxu0 %vm111_vm1, %v406_v49 }
 0x2fb   :  { %1334 = vmatpush3.bf16.msra.mxu0 %v544_v48  ;;  %1335 = vmatprep.mubr.msk.bf16.mxu0 %vm1592_vm0, %v1591_v0 }
 0x2fc   :  { %1347 = vmatprep.subr.bf16.mxu0 %v1591_v0 }
 0x3c5   :  { %v1748_v51 = vpop.f32.mrb[4].mxu0 }
 0x3c6   :  { %v1309_v52 = vpop.f32.mrb[5].mxu0 }
 0x3c7   :  { %v336_v53 = vpop.f32.mrb[6].mxu0 }
 0x3c8   :  { %v1310_v54 = vpop.f32.mrb[7].mxu0 }
 0x3cd   :  { %v466_v56 = vpop.f32.mrb[8].mxu0 }
 0x3ce   :  { %v467_v57 = vadd.f32 %v1207_v55, %v466_v56  ;;  %v1325_v58 = vpop.f32.mrb[9].mxu0 }
 0x3cf   :  { %v469_v59 = vpop.f32.mrb[10].mxu0 }
 0x3d0   :  { %v472_v60 = vmax.f32 %v467_v57, 0.0  ;;  %v1326_v61 = vpop.f32.mrb[11].mxu0 }
 0x3d2   :  { %v473_v62 = vpack.c.bf16 %v472_v60, %v472_v60 }
 0x3d4   :  { %1330 = vmatmul.mubr.msk.bf16.vlgmr.msra.gmra.mrb[12].mxu1 %vm228_vm4, %v473_v62  ;;  %v1014_v62 = vld [vmem:[#allocation8 + $0x8] sm:$0xff] }
 0x3d5   :  { %1343 = vmatprep.mubr.msk.bf16.mxu1 %vm1592_vm0, %v1591_v0  ;;  %1340 = vmatpush3.bf16.msra.mxu1 %v1432_v63 }
 0x3d6   :  { %1341 = vmatprep.subr.bf16.mxu1 %v1591_v0 }
 0x3d9   :  { %1342 = vmatpush3.bf16.msra.mxu1 %v1434_v12 }
 0x3da   :  { %1355 = vmatprep.subr.bf16.mxu1 %v1591_v0 }
 0x4a7   :  { %v525_v2 = vpop.f32.mrb[12].mxu1 }
 0x4a8   :  { %v526_v3 = vadd.f32 %v1211_v1, %v525_v2  ;;  %v1331_v5 = vpop.f32.mrb[13].mxu1 }
 0x4a9   :  { %v528_v6 = vpop.f32.mrb[14].mxu1 }
 0x4aa   :  { %v531_v7 = vmax.f32 %v526_v3, 0.0  ;;  %v1332_v8 = vpop.f32.mrb[15].mxu1 }
 0x4ab   :  { %v1012_v8 = vld [vmem:[#allocation8] sm:$0xff] }
 0x4ac   :  { %v532_v10 = vpack.c.bf16 %v531_v7, %v531_v7 }
 0x4ae   :  { %1336 = vmatmul.mubr.msk.bf16.vlgmr.msra.gmra.mrb[12].mxu0 %vm164_vm3, %v532_v10 }
 0x4af   :  { %1348 = vmatpush3.bf16.msra.mxu0 %v1754_v9  ;;  %1351 = vmatprep.mubr.msk.bf16.mxu0 %vm1592_vm0, %v1591_v0 }
 0x4b0   :  { %1349 = vmatprep.subr.bf16.mxu0 %v1591_v0 }
 0x4b3   :  { %1350 = vmatpush3.bf16.msra.mxu0 %v1758_v11 }
 0x4b4   :  { %1363 = vmatprep.subr.bf16.mxu0 %v1591_v0 }
 0x4b6   :  { %1352 = vmatmul.mubr.msk.bf16.vlgmr.msra.gmra.mrb[16].mxu0 %vm111_vm1, %v1729_v28  ;;  %v1222_v28 = vld [vmem:[#allocation10 + $0x8] ss:$0 sm:$0xff] }
 0x4b7   :  { %1365 = vmatprep.mubr.msk.bf16.mxu0 %vm1592_vm0, %v1591_v0  ;;  %1364 = vmatpush3.bf16.msra.mxu0 %v1437_v26 }
 0x4b8   :  { %1377 = vmatprep.subr.bf16.mxu0 %v1591_v0 }
 0x581   :  { %v580_v14 = vpop.f32.mrb[12].mxu0 }
 0x582   :  { %v581_v15 = vadd.f32 %v1214_v13, %v580_v14  ;;  %v1337_v16 = vpop.f32.mrb[13].mxu0 }
 0x583   :  { %v583_v17 = vpop.f32.mrb[14].mxu0 }
 0x584   :  { %v586_v18 = vpack.c.bf16 %v581_v15, %v581_v15  ;;  %v1338_v19 = vpop.f32.mrb[15].mxu0 }
 0x586   :  { %1344 = vmatmul.mubr.msk.bf16.vlgmr.msra.gmra.mrb[16].mxu1 %vm111_vm1, %v586_v18 }
 0x587   :  { %1359 = vmatprep.mubr.msk.bf16.mxu1 %vm1592_vm0, %v1591_v0  ;;  %1356 = vmatpush3.bf16.msra.mxu1 %v1435_v24 }
 0x588   :  { %1357 = vmatprep.subr.bf16.mxu1 %v1591_v0 }
 0x589   :  { %v698_v20 = vpop.f32.mrb[16].mxu0 }
 0x58a   :  { %v1353_v21 = vpop.f32.mrb[17].mxu0 }
 0x58b   :  { %v701_v22 = vpop.f32.mrb[18].mxu0  ;;  %1358 = vmatpush3.bf16.msra.mxu1 %v1436_v25  ;;  %v1236_v21 = vld [vmem:[#allocation10 + $0xb] ss:$0 sm:$0xff] }
 0x58c   :  { %v1354_v23 = vpop.f32.mrb[19].mxu0  ;;  %1369 = vmatprep.subr.bf16.mxu1 %v1591_v0 }
 0x659   :  { %v646_v27 = vpop.f32.mrb[16].mxu1 }
 0x65a   :  { %v699_v29 = vadd.f32 %v698_v20, %v646_v27  ;;  %v1345_v30 = vpop.f32.mrb[17].mxu1 }
 0x65b   :  { %v649_v31 = vpop.f32.mrb[18].mxu1 }
 0x65c   :  { %v709_v32 = vadd.f32 %v1222_v28, %v699_v29  ;;  %v1346_v33 = vpop.f32.mrb[19].mxu1 }
 0x65e   :  { %v710_v34 = vmax.f32 %v709_v32, 0.0 }
 0x660   :  { %v711_v35 = vpack.c.bf16 %v710_v34, %v710_v34 }
 0x662   :  { %1360 = vmatmul.mubr.msk.bf16.vlgmr.msra.gmra.mrb[20].mxu1 %vm111_vm1, %v711_v35 }
 0x663   :  { %1370 = vmatpush3.bf16.msra.mxu1 %v1432_v63  ;;  %1373 = vmatprep.mubr.msk.bf16.mxu1 %vm1592_vm0, %v1591_v0 }
 0x664   :  { %1371 = vmatprep.subr.bf16.mxu1 %v1591_v0 }
 0x667   :  { %1372 = vmatpush3.bf16.msra.mxu1 %v1434_v12 }
 0x668   :  { %1385 = vmatprep.subr.bf16.mxu1 %v1591_v0 }
 0x66a   :  { %1374 = vmatmul.mubr.msk.bf16.vlgmr.msra.gmra.mrb[24].mxu1 %vm111_vm1, %v1711_v4  ;;  %v334_v4 = vadd.f32 %v1199_v44, %v1748_v51 }
 0x66b   :  { %1386 = vmatpush3.bf16.msra.mxu1 %v1435_v24  ;;  %1389 = vmatprep.mubr.msk.bf16.mxu1 %vm1592_vm0, %v1591_v0 }
 0x66c   :  { %1387 = vmatprep.subr.bf16.mxu1 %v1591_v0  ;;  %v339_v45 = vpack.c.bf16 %v334_v4, %v334_v4 }
 0x66f   :  { %1388 = vmatpush3.bf16.msra.mxu1 %v1436_v25 }
 0x670   :  { %1399 = vmatprep.subr.mxu1 %v1591_v0 }
 0x735   :  { %v771_v37 = vpop.f32.mrb[20].mxu1 }
 0x736   :  { %v772_v38 = vadd.f32 %v1223_v36, %v771_v37  ;;  %v1361_v39 = vpop.f32.mrb[21].mxu1 }
 0x737   :  { %v774_v40 = vpop.f32.mrb[22].mxu1 }
 0x738   :  { %v777_v41 = vmax.f32 %v772_v38, 0.0  ;;  %v1362_v42 = vpop.f32.mrb[23].mxu1 }
 0x73a   :  { %v778_v43 = vpack.c.bf16 %v777_v41, %v777_v41 }
 0x73c   :  { %1366 = vmatmul.mubr.msk.bf16.vlgmr.msra.gmra.mrb[20].mxu0 %vm228_vm4, %v778_v43 }
 0x73d   :  { %1378 = vmatpush3.bf16.msra.mxu0 %v1754_v9  ;;  %1381 = vmatprep.mubr.msk.bf16.mxu0 %vm1592_vm0, %v1591_v0  ;;  %v871_v46 = vpop.f32.mrb[24].mxu1  ;;  %v1227_v9 = vld [vmem:[#allocation10 + $0xa] ss:$0 sm:$0xff] }
 0x73e   :  { %1379 = vmatprep.subr.bf16.mxu0 %v1591_v0  ;;  %v1375_v47 = vpop.f32.mrb[25].mxu1 }
 0x73f   :  { %v874_v48 = vpop.f32.mrb[26].mxu1 }
 0x740   :  { %v1376_v49 = vpop.f32.mrb[27].mxu1 }
 0x741   :  { %1380 = vmatpush3.bf16.msra.mxu0 %v1758_v11 }
 0x742   :  { %1393 = vmatprep.subr.bf16.mxu0 %v1591_v0 }
 0x744   :  { %1382 = vmatmul.mubr.msk.bf16.vlgmr.msra.gmra.mrb[24].mxu0 %vm111_vm1, %v339_v45 }
 0x745   :  { %1394 = vmatpush3.bf16.msra.mxu0 %v1437_v26  ;;  %1395 = vmatprep.mubr.msk.bf16.mxu0 %vm1592_vm0, %v1591_v0 }
 0x746   :  { %1404 = vmatprep.subr.mxu0 %v1591_v0 }
 0x80f   :  { %v830_v50 = vpop.f32.mrb[20].mxu0 }
 0x810   :  { %v1367_v51 = vpop.f32.mrb[21].mxu0  ;;  %v831_v10 = vadd.f32 %v1227_v9, %v830_v50 }
 0x811   :  { %v833_v52 = vpop.f32.mrb[22].mxu0 }
 0x812   :  { %v1368_v53 = vpop.f32.mrb[23].mxu0  ;;  %v836_v11 = vmax.f32 %v831_v10, 0.0 }
 0x817   :  { %v914_v54 = vpop.f32.mrb[24].mxu0 }
 0x818   :  { %v915_v55 = vadd.f32 %v914_v54, %v871_v46  ;;  %v1383_v56 = vpop.f32.mrb[25].mxu0 }
 0x819   :  { %v917_v57 = vpop.f32.mrb[26].mxu0 }
 0x81a   :  { %v920_v58 = vadd.f32 %v1222_v28, %v915_v55  ;;  %v1384_v59 = vpop.f32.mrb[27].mxu0 }
 0x81c   :  { %v921_v60 = vmax.f32 %v920_v58, 0.0 }
 0x81e   :  { %v922_v61 = vpack.c.bf16 %v921_v60, %v921_v60 }
 0x820   :  { %1390 = vmatmul.mubr.msk.bf16.vlgmr.msra.gmra.mrb[28].mxu1 %vm111_vm1, %v922_v61 }
 0x821   :  { %1401 = vmatprep.mubr.msk.f32.mxu1 %vm1592_vm0, %v1591_v0  ;;  %1400 = vmatpush3.msra.mxu1 %v1014_v62 }
 0x8f3   :  { %v960_v63 = vpop.f32.mrb[28].mxu1 }
 0x8f4   :  { %v961_v1 = vadd.f32 %v1223_v36, %v960_v63  ;;  %v1391_v2 = vpop.f32.mrb[29].mxu1 }
 0x8f5   :  { %v963_v3 = vpop.f32.mrb[30].mxu1 }
 0x8f6   :  { %v966_v5 = vmax.f32 %v961_v1, 0.0  ;;  %v1392_v6 = vpop.f32.mrb[31].mxu1 }
 0x8f8   :  { %v967_v7 = vpack.c.bf16 %v966_v5, %v966_v5 }
 0x8fa   :  { %1396 = vmatmul.mubr.msk.bf16.vlgmr.msra.gmra.mrb[28].mxu0 %vm228_vm4, %v967_v7 }
 0x8fb   :  { %1405 = vmatpush3.msra.mxu0 %v1012_v8  ;;  %1406 = vmatprep.mubr.msk.f32.mxu0 %vm1592_vm0, %v1591_v0 }
 0x902   :  { %1407 = vmatmul.mubr.msk.f32.vlgmr.msra.gmra.mrb[32].mxu0 %vm164_vm3, %v836_v11 }
 0x9cd   :  { %v1005_v12 = vpop.f32.mrb[28].mxu0 }
 0x9ce   :  { %v1006_v13 = vadd.f32 %v1227_v9, %v1005_v12  ;;  %v1397_v14 = vpop.f32.mrb[29].mxu0 }
 0x9cf   :  { %v1008_v15 = vpop.f32.mrb[30].mxu0 }
 0x9d0   :  { %v1011_v16 = vmax.f32 %v1006_v13, 0.0  ;;  %v1398_v17 = vpop.f32.mrb[31].mxu0 }
 0x9d2   :  { %1402 = vmatmul.mubr.msk.f32.vlgmr.msra.gmra.mrb[32].mxu1 %vm164_vm3, %v1011_v16 }
 0x9d5   :  { %v1157_v18 = vpop.f32.mrb[32].mxu0 }
 0x9d6   :  { %v1408_v19 = vpop.f32.mrb[33].mxu0 }
 0xaa5   :  { %v1084_v20 = vpop.f32.mrb[32].mxu1 }
 0xaa6   :  { %v1158_v22 = vadd.f32 %v1157_v18, %v1084_v20  ;;  %v1403_v23 = vpop.f32.mrb[33].mxu1 }
 0xaa8   :  { %v1166_v24 = vadd.f32 %v1236_v21, %v1158_v22 }
 0xaaa   :  { %v1167_v0 = vsub.f32 0.0, %v1166_v24 }
 0xaac   :  { %v1168_v25 = vmul.f32 1.442695, %v1167_v0 }
 0xaae   :  { %1438 = vpow2.f32 %v1168_v25 }
 0xab8   :  { %v1439_v26 = vpop.eup %1438 }
 0xab9   :  { %v1170_v27 = vadd.f32 1.0, %v1439_v26 }
 0xabb   :  { %1440 = vrcp.f32 %v1170_v27 }
 0xac5   :  { %v1441_v28 = vpop.eup %1440 }
 0xac6   :  { %1172 = vst.msk [vmem:[#allocation11] sm:$0xff] %vm164_vm3, %v1441_v28 }
 0xac7   :  { %1563 = shalt.err (!%p1560_p2)
}
 0xac8   :  { %s1564_s30 = scalar_lea.hbm %s1825_s5, 128 }
 0xac9   :  { %p1565_p3 = scmp.ne.s32.totalorder %s1825_s5, %s1564_s30  ;;  %p1568_p4 = scmp.lt.u32.totalorder %s1564_s30, %s1825_s5 }
 0xacb   :  { %p1570_p5 = pnand %p1568_p4, %p1565_p3 }
 0xacd   :  { %1573 = shalt.err (!%p1570_p5)
}
 0xace   :  { %1182 = dma.vmem_to_hbm [thread:$0]  %s1180_s1, 128, %s1825_s5, [#allocation4]  }
 0xacf   :  { %1580 = dma.done.wait [#allocation4], 128  }
 0xad0   :  { %1581 = vsyncadd [#allocation4], 4294967168 }
 0xad1   :  { %1186 = vsyncpa [#allocation3], 1 }
 0xad2   :  { %1187 = vsyncpa [#allocation6], 1 }
 0xad3   :  { %1188 = vsyncpa [#allocation9], 1 }
 0xad4   :  { %1189 = vsyncpa [#allocation4], 1 }

</bundles_post_ra>
